<compile_context>
chip_gen: v5e
topology: v5e:2x2
jax: 0.10.0
libtpu: 0.0.40
codegen_flags: <defaults>
</compile_context>

<pallas_src>
import jax
import jax.numpy as jnp
from jax.experimental import pallas as pl
from jax.experimental.pallas import tpu as pltpu


# ----------------------------------------------------------------------------
# Kernels
# ----------------------------------------------------------------------------

def _make_se_kernel(inv_hw):
    """Fused pool + excitation + scale. inv_hw is a Python float (1 / HW)."""

    def se_kernel(x_ref, w1_ref, w2_ref, o_ref):
        # x_ref:  (bt, C, HW)   full-extent C / HW (lane axis may be masked)
        # w1_ref: (Cr, C)       fc1.weight, PyTorch layout
        # w2_ref: (C, Cr)       fc2.weight, PyTorch layout
        # o_ref:  (bt, C, HW)

        # --- squeeze: global average pool (accumulate in f32) ---
        pooled = jnp.sum(x_ref[...].astype(jnp.float32), axis=-1) * inv_hw  # (bt, C)

        # --- excitation: fc1 -> relu -> fc2 -> sigmoid ---
        # einsum orders chosen so dot_general's natural output order matches
        # (no in-kernel transposes); these matmuls are tiny and hidden under
        # the x DMA (HBM-bandwidth bound kernel).
        h = jnp.einsum("bc,rc->br", pooled, w1_ref[...],
                       preferred_element_type=jnp.float32)                  # (bt, Cr)
        h = jnp.maximum(h, 0.0)
        s = jnp.einsum("br,cr->bc", h, w2_ref[...],
                       preferred_element_type=jnp.float32)                  # (bt, C)
        gate = jax.nn.sigmoid(s)                                            # (bt, C)

        # --- scale: broadcast per-channel gate over the spatial lanes ---
        xv = x_ref[...]
        o_ref[...] = (xv * gate.astype(xv.dtype)[:, :, None]).astype(o_ref.dtype)

    return se_kernel


def _make_pool_kernel(inv_hw):
    """Fallback pass 1: per-(batch, channel-tile) global average pool."""

    def pool_kernel(x_ref, pooled_ref):
        # x_ref: (1, ct, HW) ; pooled_ref: (1, 1, 1, ct)
        s = jnp.sum(x_ref[...].astype(jnp.float32), axis=-1) * inv_hw       # (1, ct)
        pooled_ref[...] = s.reshape(pooled_ref.shape)

    return pool_kernel


def _scale_kernel(x_ref, gate_ref, o_ref):
    """Fallback pass 2: out = x * gate (gate = sigmoid(fc2(relu(fc1(pool)))))."""
    # x_ref: (1, ct, HW) ; gate_ref: (1, 1, ct, 1) ; o_ref: (1, ct, HW)
    xv = x_ref[...]
    g = gate_ref[0]                                                          # (1, ct, 1)
    o_ref[...] = (xv * g.astype(xv.dtype)).astype(o_ref.dtype)


# ----------------------------------------------------------------------------
# Tiling / VMEM heuristics
# ----------------------------------------------------------------------------

def _vmem_budgets():
    """(slab_budget, vmem_limit, physical_capacity) in bytes, per generation."""
    cap = 64 * 1024 * 1024            # conservative default (v7x: 64 MiB / TC)
    try:
        cap = int(pltpu.get_tpu_info().vmem_capacity_bytes)
    except Exception:
        pass
    if cap <= 80 * 1024 * 1024:       # v7x-class (64 MiB per TensorCore)
        slab = 36 * 1024 * 1024
        limit = 48 * 1024 * 1024
    else:                             # v5e / v6e (128 MiB per TensorCore)
        slab = 80 * 1024 * 1024
        limit = 100 * 1024 * 1024
    return slab, limit, cap


def _pick_batch_tile(B, C, HW, itemsize, slab_budget_bytes):
    """Largest bt dividing B whose double-buffered in+out slab fits the budget,
    preferring an even grid >= 4 (v7x megacore balance + steady pipelining),
    then a grid >= 2, then the largest fitting divisor."""
    per_b = C * HW * itemsize
    bt_max = max(1, slab_budget_bytes // (4 * per_b))   # 2 buffers x (in + out)
    bt_max = int(min(bt_max, B))
    divisors = [d for d in range(1, bt_max + 1) if B % d == 0]
    for d in reversed(divisors):
        g = B // d
        if g >= 4 and g % 2 == 0:
            return d
    for d in reversed(divisors):
        if B // d >= 2:
            return d
    return divisors[-1]


def _pick_channel_tile(C, HW, itemsize, slab_budget_bytes):
    """Channel tile for the two-pass fallback: a divisor of C that is a
    multiple of 8 (sublane tiling) or C itself, fitting the slab budget."""
    valid = [d for d in range(1, C + 1) if C % d == 0 and (d % 8 == 0 or d == C)]
    per_c = HW * itemsize
    fit = [d for d in valid if 4 * d * per_c <= slab_budget_bytes]
    return fit[-1] if fit else valid[0]


# ----------------------------------------------------------------------------
# Forward
# ----------------------------------------------------------------------------

def se_forward(x, w1, w2, *, slab_budget_bytes=None, vmem_limit_bytes=None,
               force_two_pass=False):
    """x:  (B, C, H, W) f32 or bf16 (NCHW, same as PyTorch)
       w1: (C//r, C)   fc1.weight (PyTorch layout, no transpose needed)
       w2: (C, C//r)   fc2.weight (PyTorch layout, no transpose needed)"""
    B, C, H, W = x.shape
    HW = H * W
    Cr = w1.shape[0]
    itemsize = jnp.dtype(x.dtype).itemsize
    w_bytes = (w1.size + w2.size) * jnp.dtype(w1.dtype).itemsize

    slab_d, limit_d, cap = _vmem_budgets()
    slab = slab_d if slab_budget_bytes is None else slab_budget_bytes
    limit = limit_d if vmem_limit_bytes is None else vmem_limit_bytes
    hard_cap = max(int(cap * 0.8), 32 * 1024 * 1024)
    margin = 2 * 1024 * 1024

    x_flat = x.reshape(B, C, HW)
    per_b = C * HW * itemsize
    inv_hw = 1.0 / HW

    cost = pl.CostEstimate(
        flops=2 * B * C * HW + 4 * B * C * Cr,
        transcendentals=B * C,
        bytes_accessed=2 * B * C * HW * itemsize + w_bytes)

    # ---- fused single-pass path (read x once, write out once) ----
    need_bt1 = 4 * per_b + 2 * w_bytes + margin
    if not force_two_pass and need_bt1 <= max(limit, hard_cap):
        bt = _pick_batch_tile(B, C, HW, itemsize, slab)
        vmem_lim = max(limit, 4 * bt * per_b + 2 * w_bytes + margin)

        out = pl.pallas_call(
            _make_se_kernel(inv_hw),
            out_shape=jax.ShapeDtypeStruct((B, C, HW), x.dtype),
            grid_spec=pltpu.PrefetchScalarGridSpec(
                num_scalar_prefetch=0,
                grid=(B // bt,),
                in_specs=[
                    pl.BlockSpec((bt, C, HW), lambda b: (b, 0, 0)),
                    pl.BlockSpec((Cr, C), lambda b: (0, 0)),
                    pl.BlockSpec((C, Cr), lambda b: (0, 0)),
                ],
                out_specs=pl.BlockSpec((bt, C, HW), lambda b: (b, 0, 0)),
            ),
            compiler_params=pltpu.CompilerParams(
                dimension_semantics=("parallel",),
                vmem_limit_bytes=int(vmem_lim)),
            cost_estimate=cost,
        )(x_flat, w1, w2)
        return out.reshape(B, C, H, W)

    # ---- two-pass fallback: even one image's slab does not fit VMEM ----
    # Pass 1: C-tiled pooling kernel.  The excitation (two (B,C)x(C,Cr) tiny
    # matmuls + sigmoid) runs in plain JAX -- O(B*C*Cr), negligible traffic.
    # Pass 2: C-tiled scale kernel.
    ct = _pick_channel_tile(C, HW, itemsize, slab)
    nC = C // ct
    tile_lim = max(limit, 4 * ct * HW * itemsize + margin)

    pooled4 = pl.pallas_call(
        _make_pool_kernel(inv_hw),
        out_shape=jax.ShapeDtypeStruct((B, nC, 1, ct), jnp.float32),
        grid_spec=pltpu.PrefetchScalarGridSpec(
            num_scalar_prefetch=0,
            grid=(B, nC),
            in_specs=[pl.BlockSpec((1, ct, HW), lambda b, c: (b, c, 0))],
            out_specs=pl.BlockSpec((1, 1, 1, ct), lambda b, c: (b, c, 0, 0)),
        ),
        compiler_params=pltpu.CompilerParams(
            dimension_semantics=("parallel", "parallel"),
            vmem_limit_bytes=int(tile_lim)),
    )(x_flat)
    pooled = pooled4.reshape(B, C)

    h = jnp.maximum(pooled @ w1.astype(jnp.float32).T, 0.0)
    gate = jax.nn.sigmoid(h @ w2.astype(jnp.float32).T)                     # (B, C) f32
    gate4 = gate.reshape(B, nC, ct, 1)

    out = pl.pallas_call(
        _scale_kernel,
        out_shape=jax.ShapeDtypeStruct((B, C, HW), x.dtype),
        grid_spec=pltpu.PrefetchScalarGridSpec(
            num_scalar_prefetch=0,
            grid=(B, nC),
            in_specs=[pl.BlockSpec((1, ct, HW), lambda b, c: (b, c, 0)),
                      pl.BlockSpec((1, 1, ct, 1), lambda b, c: (b, c, 0, 0))],
            out_specs=pl.BlockSpec((1, ct, HW), lambda b, c: (b, c, 0)),
        ),
        compiler_params=pltpu.CompilerParams(
            dimension_semantics=("parallel", "parallel"),
            vmem_limit_bytes=int(tile_lim)),
        cost_estimate=cost,
    )(x_flat, gate4)
    return out.reshape(B, C, H, W)


# ----------------------------------------------------------------------------
# Reference + tests
# ----------------------------------------------------------------------------

def se_reference(x, w1, w2):
    xf = x.astype(jnp.float32)
    y = jnp.mean(xf, axis=(2, 3))                                # (B, C)
    y = jnp.maximum(y @ w1.astype(jnp.float32).T, 0.0)           # (B, C//r)
    y = jax.nn.sigmoid(y @ w2.astype(jnp.float32).T)             # (B, C)
    return xf * y[:, :, None, None]


def _run_case(key, B, C, H, W, reduction, dtype=jnp.float32, tol=1e-5,
              **fwd_kwargs):
    Cr = max(1, C // reduction)
    kx, k1, k2 = jax.random.split(key, 3)
    x = jax.random.normal(kx, (B, C, H, W), dtype=jnp.float32).astype(dtype)
    w1 = (jax.random.uniform(k1, (Cr, C), dtype=jnp.float32,
                             minval=-1.0, maxval=1.0) * (1.0 / (C ** 0.5)))
    w2 = (jax.random.uniform(k2, (C, Cr), dtype=jnp.float32,
                             minval=-1.0, maxval=1.0) * (1.0 / (Cr ** 0.5)))

    out = jax.block_until_ready(se_forward(x, w1, w2, **fwd_kwargs))
    ref = se_reference(x, w1, w2)
    assert out.shape == (B, C, H, W)
    assert out.dtype == x.dtype
    assert jnp.allclose(out.astype(jnp.float32), ref, atol=tol, rtol=tol), \
        "mismatch vs reference"


if __name__ == "__main__":
    key = jax.random.PRNGKey(0)
    k_a, k_b, k_c, k_d = jax.random.split(key, 4)

    # Fused path, 128-aligned spatial extent (16*16 = 256).
    _run_case(k_a, B=2, C=64, H=16, W=16, reduction=16)
    # Fused path, unpadded non-aligned extent (7*7 = 49 -> masked lane ops).
    _run_case(k_b, B=2, C=32, H=7, W=7, reduction=16)
    # bf16 I/O (halves HBM traffic); math in f32, loose tolerance for bf16 store.
    _run_case(k_c, B=2, C=64, H=14, W=14, reduction=16,
              dtype=jnp.bfloat16, tol=5e-2)
    # Two-pass fallback (oversized-block guard), forced with a tiny slab budget
    # so the channel tiling (ct < C) is exercised as well.
    _run_case(k_d, B=2, C=64, H=16, W=16, reduction=16,
              force_two_pass=True, slab_budget_bytes=64 * 1024)

    print("KERNEL_OK")
</pallas_src>

<mosaic_0001>
module attributes {stable_mosaic.version = 11 : i64} {
  func.func @se_kernel(%arg0: i32, %arg1: memref<1x64x256xf32, #tpu.memory_space<vmem>>, %arg2: memref<4x64xf32, #tpu.memory_space<vmem>>, %arg3: memref<64x4xf32, #tpu.memory_space<vmem>>, %arg4: memref<1x64x256xf32, #tpu.memory_space<vmem>>) attributes {dimension_semantics = [#tpu.dimension_semantics<parallel>], iteration_bounds = array<i64: 2>, scalar_prefetch = 0 : i64, scratch_operands = 0 : i64, tpu.core_type = #tpu.core_type<tc>, window_params = [{transform_indices = @transform_0, window_bounds = array<i64: 1, 64, 256>}, {pipeline_mode = #tpu.pipeline_mode<synchronous>, transform_indices = @transform_1, window_bounds = array<i64: 4, 64>}, {pipeline_mode = #tpu.pipeline_mode<synchronous>, transform_indices = @transform_2, window_bounds = array<i64: 64, 4>}, {transform_indices = @transform_3, window_bounds = array<i64: 1, 64, 256>}]} {
    %c0 = arith.constant 0 : index
    %c0_0 = arith.constant 0 : index
    %c0_1 = arith.constant 0 : index
    %0 = vector.load %arg1[%c0, %c0_0, %c0_1] : memref<1x64x256xf32, #tpu.memory_space<vmem>>, vector<1x64x256xf32>
    %cst = arith.constant dense<0.000000e+00> : vector<1x64xf32>
    %1 = vector.multi_reduction <add>, %0, %cst [2] : vector<1x64x256xf32> to vector<1x64xf32>
    %cst_2 = arith.constant 3.906250e-03 : f32
    %2 = vector.broadcast %cst_2 : f32 to vector<1x64xf32>
    %3 = arith.mulf %1, %2 : vector<1x64xf32>
    %c0_3 = arith.constant 0 : index
    %c0_4 = arith.constant 0 : index
    %4 = vector.load %arg2[%c0_3, %c0_4] : memref<4x64xf32, #tpu.memory_space<vmem>>, vector<4x64xf32>
    "tpu.trace_start"() <{level = 10 : i32, message = "bc,rc->br"}> : () -> ()
    %cst_5 = arith.constant dense<0.000000e+00> : vector<1x4xf32>
    %5 = tpu.matmul %3, %4, %cst_5 {dimension_numbers = #tpu.dot_dimension_numbers<[1], [1], [0], [0], [0, 0, 1, 0], [], []>} : vector<1x64xf32>, vector<4x64xf32>, vector<1x4xf32> -> vector<1x4xf32>
    "tpu.trace_stop"() : () -> ()
    %cst_6 = arith.constant 0.000000e+00 : f32
    %6 = vector.broadcast %cst_6 : f32 to vector<1x4xf32>
    %7 = arith.maximumf %5, %6 : vector<1x4xf32>
    %c0_7 = arith.constant 0 : index
    %c0_8 = arith.constant 0 : index
    %8 = vector.load %arg3[%c0_7, %c0_8] : memref<64x4xf32, #tpu.memory_space<vmem>>, vector<64x4xf32>
    "tpu.trace_start"() <{level = 10 : i32, message = "br,cr->bc"}> : () -> ()
    %cst_9 = arith.constant dense<0.000000e+00> : vector<1x64xf32>
    %9 = tpu.matmul %7, %8, %cst_9 {dimension_numbers = #tpu.dot_dimension_numbers<[1], [1], [0], [0], [0, 0, 1, 0], [], []>} : vector<1x4xf32>, vector<64x4xf32>, vector<1x64xf32> -> vector<1x64xf32>
    "tpu.trace_stop"() : () -> ()
    %10 = arith.negf %9 : vector<1x64xf32>
    %11 = math.exp %10 : vector<1x64xf32>
    %cst_10 = arith.constant 1.000000e+00 : f32
    %12 = vector.broadcast %cst_10 : f32 to vector<1x64xf32>
    %13 = arith.addf %12, %11 : vector<1x64xf32>
    %14 = arith.divf %12, %13 : vector<1x64xf32>
    %c0_11 = arith.constant 0 : index
    %c0_12 = arith.constant 0 : index
    %c0_13 = arith.constant 0 : index
    %15 = vector.load %arg1[%c0_11, %c0_12, %c0_13] : memref<1x64x256xf32, #tpu.memory_space<vmem>>, vector<1x64x256xf32>
    %16 = vector.shape_cast %14 : vector<1x64xf32> to vector<1x64x1xf32>
    %17 = vector.broadcast %16 : vector<1x64x1xf32> to vector<1x64x256xf32>
    %18 = arith.mulf %15, %17 : vector<1x64x256xf32>
    %c0_14 = arith.constant 0 : index
    %c0_15 = arith.constant 0 : index
    %c0_16 = arith.constant 0 : index
    %19 = vector.load %arg4[%c0_14, %c0_15, %c0_16] : memref<1x64x256xf32, #tpu.memory_space<vmem>>, vector<1x64x256xf32>
    tpu.vector_store %arg4[%c0_14, %c0_15, %c0_16], %18 {strides = array<i32>} : memref<1x64x256xf32, #tpu.memory_space<vmem>>, vector<1x64x256xf32>,
    return
  }
  func.func @transform_0(%arg0: i32) -> (i32, i32, i32) {
    %c0_i32 = arith.constant 0 : i32
    %c0_i32_0 = arith.constant 0 : i32
    %c0_i32_1 = arith.constant 0 : i32
    return %arg0, %c0_i32, %c0_i32_0 : i32, i32, i32
  }
  func.func @transform_1(%arg0: i32) -> (i32, i32) {
    %c0_i32 = arith.constant 0 : i32
    %c0_i32_0 = arith.constant 0 : i32
    %c0_i32_1 = arith.constant 0 : i32
    return %c0_i32, %c0_i32_0 : i32, i32
  }
  func.func @transform_2(%arg0: i32) -> (i32, i32) {
    %c0_i32 = arith.constant 0 : i32
    %c0_i32_0 = arith.constant 0 : i32
    %c0_i32_1 = arith.constant 0 : i32
    return %c0_i32, %c0_i32_0 : i32, i32
  }
  func.func @transform_3(%arg0: i32) -> (i32, i32, i32) {
    %c0_i32 = arith.constant 0 : i32
    %c0_i32_0 = arith.constant 0 : i32
    %c0_i32_1 = arith.constant 0 : i32
    return %arg0, %c0_i32, %c0_i32_0 : i32, i32, i32
  }
}

</mosaic_0001>

<bundles_post_ra>
// kernel: tpu_custom_call.1
= control target key start
LH: loop header
LB: loop body
LE: loop exit
PB: predicated region body
PF: predicated region fallthrough
CT: control target
= control target key end

     0   :  { %8 = vsyncpa [#allocation3], 0  ;;  %s1032_s0 = inlined_call_operand.hbm [shape: f32[2,64,256], index: 0, kind: input, shape index: {}]   ;;  %s1033_s1 = inlined_call_operand.vmem [shape: f32[4,64], index: 1, kind: input, shape index: {}]   ;;  %s1034_s2 = inlined_call_operand.vmem [shape: f32[64,4], index: 2, kind: input, shape index: {}]   ;;  %s1035_s3 = inlined_call_operand.hbm [shape: f32[2,64,256], index: 3, kind: output, shape index: {}]  }
   0x1   :  { %10 = vsyncpa [#allocation3 + $0x1], 0 }
   0x2   :  { %11 = vsyncpa [#allocation4], 0 }
   0x3   :  { %13 = vsyncpa [#allocation4 + $0x1], 0  ;;  %s780_s12 = smov 0   ;;  %s782_s13 = smov 0  }
   0x4   :  { %s784_s14 = smov 0   ;;  %s786_s15 = smov 0  }
   0x5 LB: > { %s801_s16 = sadd.s32 4294967295, %s754_s15   ;;  %s567_s17 = sadd.s32 4294967294, %s754_s15   ;;  %s754_s15 = sphi %s786_s15, %s1045_s15   ;;  %s750_s14 = sphi %s784_s14, %s1044_s14   ;;  %s746_s13 = sphi %s782_s13, %s1043_s13   ;;  %s742_s12 = sphi %s780_s12, %s1042_s12  }
   0x6   : > { %s805_s18 = sadd.s32 1, %s754_s15   ;;  %s26_s19 = sadd.s32 1, %s750_s14 }
   0x7   : > { %s23_s20 = ssub.s32 %s754_s15, %s805_s18  ;;  %p33_p0 = scmp.ne.s32.totalorder %s750_s14, %s746_s13 }
   0x8   : > { %p24_p1 = scmp.eq.s32.totalorder %s23_s20, 0  ;;  %p34_p2 = scmp.eq.s32.totalorder %s754_s15, 0 }
   0x9   : > { %p39_p3 = scmp.ne.s32.totalorder %s746_s13, %s742_s12  ;;  %p40_p4 = scmp.eq.s32.totalorder %s801_s16, 0 }
   0xa   : > { %s817_s21 = scalar_select %p24_p1, %s750_s14, %s26_s19  }
   0xb   : > { %p819_p5 = por %p34_p2, %p33_p0  ;;  %p823_p6 = por %p40_p4, %p39_p3 }
   0xc   : > { %p105_p7 = scmp.eq.s32.totalorder %s801_s16, 1  ;;  %p111_p8 = scmp.eq.s32.totalorder %s567_s17, 1 }
   0xd   : > { %p607_p10 = scmp.lt.s32.totalorder %s754_s15, 2  ;;  %s137_s26 = sand.u32 1, %s750_s14  }
   0xe   : > { %p830_p11 = por %p105_p7, %p33_p0  ;;  %p834_p12 = por %p111_p8, %p39_p3 }
   0xf   : > { %s593_s27 = sshll.u32 %s754_s15, 7  ;;  %s570_s28 = sshll.u32 %s137_s26, 7 }
  0x10   : > { %s146_s4 = scalar_lea.hbm %s1032_s0, %s593_s27  ;;  %s141_s6 = scalar_lea.vmem [#allocation2], %s570_s28 }
  0x11   : > { %s147_s5 = sshll.u32 %s146_s4, 4  ;;  %s149_s7 = sshll.u32 %s141_s6, 4  ;;  %s148_s5 = int_to_ptr.hbm [resolvable:$true] %s147_s5  ;;  %s150_s7 = int_to_ptr.vmem [resolvable:$true] %s149_s7 }
  0x12   : > { %p845_p13 = pnand %p607_p10, %p819_p5  ;;  %p573_p0 = scmp.ge.s32.totalorder %s754_s15, 1 }
  0x13   : > { %p157_p1 = scmp.lt.s32.totalorder %s754_s15, 3  ;;  %s138_s9 = scalar_lea.sflag [#allocation3], %s137_s26 }
  0x14   : > { %s658_s10 = sshra.s32 %s148_s5, 4  ;;  %p662_p3 = pneg %p845_p13  ;;  %s659_s10 = int_to_ptr.hbm [resolvable:$true] %s658_s10 }
  0x15   : > { %s660_s11 = scalar_lea.hbm %s659_s10, 128  ;;  %s665_s20 = scalar_lea.hbm %s1032_s0, 256 }
  0x16   : > { %p661_p2 = scmp.ne.s32.totalorder %s659_s10, %s660_s11  ;;  %p666_p5 = scmp.lt.s32.totalorder %s659_s10, %s1032_s0 }
  0x17   : > { %p667_p8 = scmp.lt.s32.totalorder %s665_s20, %s660_s11 }
  0x18   : > { %p663_p4 = pnand %p662_p3, %p661_p2 }
  0x19   : > { %p668_p10 = por %p667_p8, %p666_p5 }
  0x1a   : > { %p664_p7 = pneg %p663_p4 }
  0x1c   : > { %p669_p9 = pnand %p668_p10, %p664_p7 }
  0x1e   : > { %672 = shalt.err (!%p669_p9)
}
  0x1f   : > { %s756_s26 = smov 256   ;;  %s757_s28 = smov 16  }
  0x20   : > { %602 = dma.hbm_to_vmem [thread:$0]  (!%p845_p13), %s148_s5, 2048, %s150_s7, %s138_s9, %s756_s26, %s756_s26, %s757_s28  }
  0x21   : > { %p158_p2 = pnand %p573_p0, %p157_p1 }
  0x22   : > { %s866_s29 = sand.u32 (!%p158_p2), 1, %s746_s13  }
  0x23   : > { %161 = sbr.rel (%p158_p2) target bundleno = 620 (0x26c), region = 32  ;;  %s574_s30 = sshll.u32 (!%p158_p2), %s866_s29, 7 }
  0x24   : > { %s164_s4 = scalar_lea.sflag (!%p158_p2), [#allocation3], %s866_s29  ;;  %s167_s6 = scalar_lea.vmem (!%p158_p2), [#allocation2], %s574_s30 }
  0x28   : > { %733 = dma.done.wait (%p823_p6), %s164_s4, 2048  }
  0x29   : > { %735 = vsyncadd (%p823_p6), %s164_s4, 4294965248  ;;  %v876_v0 = vld [vmem:[%s167_s6] sm:$0xff]  ;;  %v878_v1 = vld [vmem:[%s167_s6 + $0x8] sm:$0xff]  ;;  %vm279_vm0 = vcmask 523264   ;;  %vm314_vm1 = vcmask 31744   ;;  %v248_v28 = vlaneseq  ;;  %vm253_vm2 = vcmask 130112  }
  0x2a   : > { %v880_v2 = vld [vmem:[%s167_s6 + $0x20] sm:$0xff]  ;;  %v207_v3 = vadd.f32 %v878_v1, %v876_v0  ;;  %v884_v4 = vld [vmem:[%s167_s6 + $0x28] sm:$0xff]  ;;  %v894_v9 = vld [vmem:[%s167_s6 + $0x10] sm:$0xff]  ;;  %vm257_vm3 = vcmask 195712   ;;  %vm261_vm4 = vcmask 261312   ;;  %vm265_vm5 = vcmask 326912  }
  0x2b   : > { %v886_v5 = vld [vmem:[%s167_s6 + $0x40] sm:$0xff]  ;;  %v888_v6 = vld [vmem:[%s167_s6 + $0x48] sm:$0xff]  ;;  %v213_v7 = vadd.f32 %v884_v4, %v880_v2  ;;  %v896_v10 = vld [vmem:[%s167_s6 + $0x18] sm:$0xff]  ;;  %v249_v33 = vand.u32 127, %v248_v28  ;;  %vm269_vm6 = vcmask 392512   ;;  %vm273_vm7 = vcmask 458112  }
  0x2c   : > { %v219_v8 = vadd.f32 %v888_v6, %v886_v5  ;;  %208 = vadd.xlane.f32.xlu0 %v207_v3  ;;  %v898_v11 = vld [vmem:[%s167_s6 + $0x30] sm:$0xff]  ;;  %v900_v12 = vld [vmem:[%s167_s6 + $0x38] sm:$0xff]  ;;  %v210_v15 = vadd.f32 %v896_v10, %v894_v9  ;;  %v912_v18 = vld [vmem:[%s167_s6 + $0x60] sm:$0xff]  ;;  %vm277_vm8 = vcmask 523712   ;;  %s966_s7 = scalar_lea.vmem [#allocation5], %s574_s30  ;;  %s594_s30 = sshll.u32 %s801_s16, 7 }
  0x2d   : > { %214 = vadd.xlane.f32.xlu1 %v213_v7  ;;  %v902_v13 = vld [vmem:[%s167_s6 + $0x50] sm:$0xff]  ;;  %v904_v14 = vld [vmem:[%s167_s6 + $0x58] sm:$0xff]  ;;  %v216_v16 = vadd.f32 %v900_v12, %v898_v11  ;;  %v914_v19 = vld [vmem:[%s167_s6 + $0x68] sm:$0xff]  ;;  %v251_v36 = vadd.s32 4294967288, %v249_v33  ;;  %v255_v37 = vadd.s32 4294967280, %v249_v33  ;;  %v259_v40 = vadd.s32 4294967272, %v249_v33  ;;  %s490_s10 = scalar_lea.hbm %s1035_s3, %s594_s30 }
  0x2e   : > { %220 = vadd.xlane.f32.xlu2 %v219_v8  ;;  %v222_v17 = vadd.f32 %v904_v14, %v902_v13  ;;  %v916_v20 = vld [vmem:[%s167_s6 + $0x70] sm:$0xff]  ;;  %v918_v21 = vld [vmem:[%s167_s6 + $0x78] sm:$0xff]  ;;  %v225_v22 = vadd.f32 %v914_v19, %v912_v18  ;;  %v239_v24 = vld [vmem:[%s1033_s1] sm:$0xf]  ;;  %v263_v45 = vadd.s32 4294967264, %v249_v33  ;;  %v267_v52 = vadd.s32 4294967256, %v249_v33 }
  0x2f   : > { %v228_v23 = vadd.f32 %v918_v21, %v916_v20  ;;  %576 = vmatpush.xpose.msk.msra.mxu0 %vm279_vm0, %v239_v24  ;;  %v313_v25 = vld [vmem:[%s1034_s2 + $0x38] sm:$0xff]  ;;  %v312_v26 = vld [vmem:[%s1034_s2 + $0x30] sm:$0xff]  ;;  %v311_v27 = vld [vmem:[%s1034_s2 + $0x28] sm:$0xff]  ;;  %v271_v59 = vadd.s32 4294967248, %v249_v33  ;;  %v275_v62 = vadd.s32 4294967240, %v249_v33  ;;  %s491_s11 = sshll.u32 %s966_s7, 4  ;;  %s492_s11 = int_to_ptr.vmem [resolvable:$true] %s491_s11 }
  0x30   : > { %578 = vmatpush.xpose.msk.msra.mxu1 %vm314_vm1, %v313_v25  ;;  %v310_v32 = vld [vmem:[%s1034_s2 + $0x20] sm:$0xff]  ;;  %v309_v34 = vld [vmem:[%s1034_s2 + $0x18] sm:$0xff]  ;;  %v308_v44 = vld [vmem:[%s1034_s2 + $0x10] sm:$0xff]  ;;  %s493_s17 = sshll.u32 %s490_s10, 4  ;;  %s479_s16 = scalar_lea.sflag [#allocation4], %s866_s29  ;;  %s494_s17 = int_to_ptr.hbm [resolvable:$true] %s493_s17 }
  0x31   : > { %v307_v55 = vld [vmem:[%s1034_s2 + $0x8] sm:$0xff]  ;;  %v306_v24 = vld [vmem:[%s1034_s2] sm:$0xff]  ;;  %s702_s19 = sshra.s32 %s494_s17, 4  ;;  %s708_s26 = scalar_lea.hbm %s1035_s3, 256  ;;  %s703_s19 = int_to_ptr.hbm [resolvable:$true] %s702_s19 }
  0x32   : > { %s704_s20 = scalar_lea.hbm %s703_s19, 128  ;;  %p709_p0 = scmp.lt.s32.totalorder %s703_s19, %s1035_s3 }
  0x33   : > { %p705_p6 = scmp.ne.s32.totalorder %s703_s19, %s704_s20  ;;  %p710_p1 = scmp.lt.s32.totalorder %s708_s26, %s704_s20 }
  0x34   : > { %211 = vadd.xlane.f32.xlu0 %v210_v15  ;;  %579 = vmatpush.xpose.msk.msra.mxu1 %vm314_vm1, %v312_v26 }
  0x35   : > { %217 = vadd.xlane.f32.xlu1 %v216_v16  ;;  %p706_p9 = pnand %p705_p6, %p830_p11  ;;  %p711_p3 = por %p710_p1, %p709_p0 }
  0x36   : > { %223 = vadd.xlane.f32.xlu2 %v222_v17 }
  0x37   : > { %p707_p13 = pneg %p706_p9 }
  0x38   : > { %580 = vmatpush.xpose.msk.msra.mxu1 %vm314_vm1, %v311_v27  ;;  %v399_v27 = vshrl.u32 %v248_v28, 7 }
  0x39   : > { %p712_p4 = pnand %p711_p3, %p707_p13 }
  0x3a   : > { %645 = vset.pattern.permute.xlu2 %v399_v27 }
  0x3c   : > { %226 = vadd.xlane.f32.xlu0 %v225_v22  ;;  %581 = vmatpush.xpose.msk.msra.mxu1 %vm314_vm1, %v310_v32 }
  0x3d   : > { %229 = vadd.xlane.f32.xlu1 %v228_v23 }
  0x40   : > { %582 = vmatpush.xpose.msk.msra.mxu1 %vm314_vm1, %v309_v34 }
  0x44   : > { %583 = vmatpush.xpose.msk.msra.mxu1 %vm314_vm1, %v308_v44 }
  0x48   : > { %584 = vmatpush.xpose.msk.msra.mxu1 %vm314_vm1, %v307_v55 }
  0x4c   : > { %585 = vmatpush.xpose.msk.msra.mxu1 %vm314_vm1, %v306_v24 }
  0x9f   : > { %v209_v29 = vpop.xlane.xlu0 %208 }
  0xa0   : > { %v215_v30 = vpop.xlane.xlu1 %214  ;;  %v231_v35 = vmul.f32 0.00390625, %v209_v29  ;;  %v412_v29 = vadd.s32 16, %v399_v27 }
  0xa1   : > { %v221_v31 = vpop.xlane.xlu2 %220  ;;  %v233_v38 = vmul.f32 0.00390625, %v215_v30  ;;  %v406_v30 = vadd.s32 8, %v399_v27 }
  0xa2   : > { %v250_v47 = vperm.slane %v231_v35, %v249_v33  ;;  %v235_v48 = vmul.f32 0.00390625, %v221_v31  ;;  %647 = vset.pattern.permute.xlu1 %v412_v29 }
  0xa3   : > { %v256_v50 = vperm.slane %v233_v38, %v255_v37  ;;  %646 = vset.pattern.permute.xlu0 %v406_v30 }
  0xa4   : > { %v264_v57 = vperm.slane %v235_v48, %v263_v45  ;;  %v430_v45 = vadd.s32 40, %v399_v27  ;;  %v424_v48 = vadd.s32 32, %v399_v27 }
  0xa7   : > { %v212_v39 = vpop.xlane.xlu0 %211 }
  0xa8   : > { %v232_v41 = vmul.f32 0.00390625, %v212_v39  ;;  %v218_v42 = vpop.xlane.xlu1 %217 }
  0xa9   : > { %v224_v43 = vpop.xlane.xlu2 %223  ;;  %v234_v46 = vmul.f32 0.00390625, %v218_v42 }
  0xaa   : > { %v252_v49 = vperm.slane %v232_v41, %v251_v36  ;;  %v236_v53 = vmul.f32 0.00390625, %v224_v43 }
  0xab   : > { %v260_v51 = vperm.slane %v234_v46, %v259_v40  ;;  %v418_v46 = vadd.s32 24, %v399_v27 }
  0xac   : > { %v254_v54 = vsel %vm253_vm2, %v252_v49, %v250_v47  ;;  %v268_v60 = vperm.slane %v236_v53, %v267_v52  ;;  %v442_v47 = vadd.s32 56, %v399_v27  ;;  %v436_v49 = vadd.s32 48, %v399_v27 }
  0xad   : > { %v258_v56 = vsel %vm257_vm3, %v256_v50, %v254_v54 }
  0xae   : > { %v262_v58 = vsel %vm261_vm4, %v260_v51, %v258_v56 }
  0xaf   : > { %v227_v61 = vpop.xlane.xlu0 %226  ;;  %v266_v7 = vsel %vm265_vm5, %v264_v57, %v262_v58 }
  0xb0   : > { %v237_v63 = vmul.f32 0.00390625, %v227_v61  ;;  %v230_v3 = vpop.xlane.xlu1 %229  ;;  %v270_v17 = vsel %vm269_vm6, %v268_v60, %v266_v7 }
  0xb1   : > { %v238_v8 = vmul.f32 0.00390625, %v230_v3 }
  0xb2   : > { %v272_v15 = vperm.slane %v237_v63, %v271_v59 }
  0xb3   : > { %v276_v16 = vperm.slane %v238_v8, %v275_v62 }
  0xb4   : > { %v274_v22 = vsel %vm273_vm7, %v272_v15, %v270_v17 }
  0xb5   : > { %v278_v23 = vsel %vm277_vm8, %v276_v16, %v274_v22 }
  0xb6   : > { %577 = vmatmul.msk.f32.vlgmr.msra.gmra.mxu0 %vm279_vm0, %v278_v23 }
 0x133   : > { %v302_v25 = vpop.f32.mrf.mxu0 }
 0x134   : > { %v305_v26 = vmax.f32 %v302_v25, 0.0 }
 0x136   : > { %586 = vmatmul.msk.f32.vlgmr.msra.gmra.mxu1 %vm314_vm1, %v305_v26 }
 0x1b3   : > { %v359_v31 = vpop.f32.mrf.mxu1 }
 0x1b4   : > { %v587_v32 = vmul.f32 -1.442695, %v359_v31 }
 0x1b6   : > { %654 = vpow2.f32 %v587_v32 }
 0x1bc   : > { %v655_v33 = vpop.eup %654 }
 0x1bd   : > { %v365_v34 = vadd.f32 1.0, %v655_v33 }
 0x1bf   : > { %656 = vrcp.f32 %v365_v34  ;;  %v377_v38 = vand.u32 2147483648, %v365_v34  ;;  %v375_v40 = vand.u32 2147483647, %v365_v34  ;;  %vm371_vm10 = vweird.f32 %v365_v34 }
 0x1c1   : > { %v378_v28 = vor.u32 1.1754944e-38, %v377_v38  ;;  %vm376_vm12 = vcmp.eq.f32.partialorder %v375_v40, 8.507059e+37 }
 0x1c5   : > { %v657_v35 = vpop.eup %656 }
 0x1c6   : > { %v367_v36 = vmul.f32 %v657_v35, %v365_v34  ;;  %vm372_vm9 = vweird.f32 %v657_v35 }
 0x1c7   : > { %vm373_vm11 = vmor %vm371_vm10, %vm372_vm9 }
 0x1c8   : > { %v368_v37 = vsub.f32 1.0, %v367_v36 }
 0x1ca   : > { %v369_v39 = vmul.f32 %v657_v35, %v368_v37 }
 0x1cc   : > { %v370_v41 = vadd.f32 %v657_v35, %v369_v39 }
 0x1ce   : > { %v374_v42 = vsel %vm373_vm11, %v657_v35, %v370_v41 }
 0x1cf   : > { %v379_v43 = vsel %vm376_vm12, %v378_v28, %v374_v42 }
 0x1d0   : > { %v397_v44 = vperm.slane %v379_v43, 0 }
 0x1d2   : > { %414 = vperm.xlu1 %647, %v397_v44   ;;  %408 = vperm.xlu0 %646, %v397_v44  }
 0x1d3   : > { %402 = vperm.xlu2 %645, %v397_v44  }
 0x1da   : > { %650 = vset.pattern.permute.xlu1 %v430_v45  ;;  %653 = vset.pattern.permute.xlu0 %v442_v47 }
 0x1db   : > { %648 = vset.pattern.permute.xlu2 %v418_v46 }
 0x1e2   : > { %432 = vperm.xlu1 %650, %v397_v44  }
 0x1e3   : > { %420 = vperm.xlu2 %648, %v397_v44  }
 0x1ea   : > { %652 = vset.pattern.permute.xlu1 %v442_v47 }
 0x1eb   : > { %649 = vset.pattern.permute.xlu2 %v424_v48 }
 0x1f2   : > { %444 = vperm.xlu1 %652, %v397_v44  }
 0x1f3   : > { %426 = vperm.xlu2 %649, %v397_v44  }
 0x1fb   : > { %651 = vset.pattern.permute.xlu2 %v436_v49 }
 0x203   : > { %438 = vperm.xlu2 %651, %v397_v44  }
 0x22d   : > { %v403_v50 = vpop.permute.xlu2 %402 }
 0x22e   : > { %v446_v51 = vmul.f32 %v403_v50, %v876_v0  ;;  %v447_v52 = vmul.f32 %v403_v50, %v878_v1 }
 0x230   : > { %462 = vst [vmem:[%s966_s7] sm:$0xff] %v446_v51 }
 0x231   : > { %463 = vst [vmem:[%s966_s7 + $0x8] sm:$0xff] %v447_v52 }
 0x23d   : > { %v421_v53 = vpop.permute.xlu2 %420 }
 0x23e   : > { %v452_v54 = vmul.f32 %v421_v53, %v898_v11  ;;  %v453_v0 = vmul.f32 %v421_v53, %v900_v12 }
 0x240   : > { %468 = vst [vmem:[%s966_s7 + $0x30] sm:$0xff] %v452_v54 }
 0x241   : > { %469 = vst [vmem:[%s966_s7 + $0x38] sm:$0xff] %v453_v0 }
 0x244   : > { %v415_v1 = vpop.permute.xlu1 %414  ;;  %v409_v55 = vpop.permute.xlu0 %408 }
 0x245   : > { %v450_v56 = vmul.f32 %v415_v1, %v880_v2  ;;  %v451_v57 = vmul.f32 %v415_v1, %v884_v4  ;;  %v448_v58 = vmul.f32 %v409_v55, %v894_v9  ;;  %v449_v59 = vmul.f32 %v409_v55, %v896_v10 }
 0x247   : > { %466 = vst [vmem:[%s966_s7 + $0x20] sm:$0xff] %v450_v56 }
 0x248   : > { %467 = vst [vmem:[%s966_s7 + $0x28] sm:$0xff] %v451_v57 }
 0x249   : > { %464 = vst [vmem:[%s966_s7 + $0x10] sm:$0xff] %v448_v58 }
 0x24a   : > { %465 = vst [vmem:[%s966_s7 + $0x18] sm:$0xff] %v449_v59 }
 0x24d   : > { %v427_v11 = vpop.permute.xlu2 %426 }
 0x24e   : > { %v454_v12 = vmul.f32 %v427_v11, %v886_v5  ;;  %v455_v2 = vmul.f32 %v427_v11, %v888_v6 }
 0x250   : > { %470 = vst [vmem:[%s966_s7 + $0x40] sm:$0xff] %v454_v12 }
 0x251   : > { %471 = vst [vmem:[%s966_s7 + $0x48] sm:$0xff] %v455_v2 }
 0x254   : > { %v433_v4 = vpop.permute.xlu1 %432 }
 0x255   : > { %v456_v9 = vmul.f32 %v433_v4, %v902_v13  ;;  %v457_v60 = vmul.f32 %v433_v4, %v904_v14 }
 0x257   : > { %472 = vst [vmem:[%s966_s7 + $0x50] sm:$0xff] %v456_v9 }
 0x258   : > { %473 = vst [vmem:[%s966_s7 + $0x58] sm:$0xff] %v457_v60 }
 0x25d   : > { %v439_v10 = vpop.permute.xlu2 %438 }
 0x25e   : > { %v458_v61 = vmul.f32 %v439_v10, %v912_v18  ;;  %v459_v5 = vmul.f32 %v439_v10, %v914_v19 }
 0x260   : > { %474 = vst [vmem:[%s966_s7 + $0x60] sm:$0xff] %v458_v61 }
 0x261   : > { %475 = vst [vmem:[%s966_s7 + $0x68] sm:$0xff] %v459_v5 }
 0x264   : > { %v445_v6 = vpop.permute.xlu1 %444 }
 0x265   : > { %v460_v13 = vmul.f32 %v445_v6, %v916_v20  ;;  %v461_v14 = vmul.f32 %v445_v6, %v918_v21 }
 0x267   : > { %476 = vst [vmem:[%s966_s7 + $0x70] sm:$0xff] %v460_v13 }
 0x268   : > { %477 = vst [vmem:[%s966_s7 + $0x78] sm:$0xff] %v461_v14 }
 0x269   : > { %715 = shalt.err (!%p712_p4)
}
 0x26a   : > { %s758_s29 = smov 256   ;;  %s759_s6 = smov 16  }
 0x26b   : > { %597 = dma.vmem_to_hbm [thread:$0]  (%p830_p11), %s492_s11, 2048, %s494_s17, %s479_s16, %s758_s29, %s758_s29, %s759_s6  }
 0x26c PF: > { %s508_s23 = sand.u32 1, %s742_s12   ;;  %p1041_p7 = scmp.ge.s32.totalorder %s754_s15, 2 }
 0x26d   : > { %s509_s5 = scalar_lea.sflag [#allocation4], %s508_s23 }
 0x26e   : > { %p604_p5 = pnand %p1041_p7, %p834_p12 }
 0x270   : > { %p605_p8 = pneg %p604_p5 }
 0x272   : > { %737 = dma.done.wait (%p605_p8), %s509_s5, 2048  }
 0x273   : > { %739 = vsyncadd (%p605_p8), %s509_s5, 4294965248  ;;  %p16_p10 = scmp.ge.s32.totalorder %s805_s18, 4   ;;  %s1042_s12 = smov %s746_s13 }
 0x274   : > { %s1043_s13 = smov %s750_s14  ;;  %s1044_s14 = smov %s817_s21 }
 0x275   : > { %s1045_s15 = smov %s805_s18  ;;  %18 = sbr.rel (!%p16_p10) target bundleno = 5 (0x5), region = 77 }
 0x27a   :  { %515 = vsyncpa [#allocation3], 1 }
 0x27b   :  { %517 = vsyncpa [#allocation3 + $0x1], 1 }
 0x27c   :  { %518 = vsyncpa [#allocation4], 1 }
 0x27d   :  { %520 = vsyncpa [#allocation4 + $0x1], 1 }

</bundles_post_ra>
